<compile_context>
chip_gen: v7x
topology: tpu7x:2x2x1
jax: 0.10.0
libtpu: 0.0.40
codegen_flags: <defaults>
</compile_context>

<pallas_src>
import jax
import jax.numpy as jnp
from jax import lax
from jax.experimental import pallas as pl
from jax.experimental.pallas import tpu as pltpu


def fancy_mlp_kernel(x_ref, w_ref, b_ref, rw_ref, out_ref):
    x = x_ref[...]        # (B, 20) f32
    w = w_ref[...]        # (20, 20) f32, PyTorch (out, in) layout
    b = b_ref[...]        # (1, 20)  f32
    rw = rw_ref[...]      # (20, 20) f32

    # x @ W^T: contract dim 1 of x with dim 1 of w (transposed-RHS MXU matmul).
    dn = (((1,), (1,)), ((), ()))

    # h = self.linear(x)
    h = lax.dot_general(x, w, dn, preferred_element_type=jnp.float32) + b
    # h = relu(h @ rand_weight + 1)
    h = jnp.maximum(jnp.dot(h, rw, preferred_element_type=jnp.float32) + 1.0, 0.0)
    # h = self.linear(h)   (same Linear reused)
    h = lax.dot_general(h, w, dn, preferred_element_type=jnp.float32) + b

    # Issue both XLU reductions back-to-back; the second hides under the
    # scalar-side scale computation below.
    norm2 = jnp.sum(h * h)      # ||h||^2  (squared domain: no sqrt needed)
    s_h = jnp.sum(h)

    # while ||h|| > 1: h /= 2   ==>  scale = 2^-k, k = max(0, ceil(log2(||h||)))
    # with log2(||h||) = 0.5 * log2(norm2).
    k = jnp.maximum(jnp.ceil(0.5 * jnp.log2(norm2)), 0.0)
    scale = jnp.exp2(-k)
    # One-step fixups: guard log2/exp2 rounding exactly at power-of-two
    # boundaries so the result matches the original halving-loop semantics.
    scale = jnp.where(norm2 * (scale * scale) > 1.0, scale * 0.5, scale)
    scale = jnp.where((scale < 1.0) & (norm2 * (scale * scale) * 4.0 <= 1.0),
                      scale * 2.0, scale)
    # if ||h|| < 0.8: h *= 10   (squared threshold 0.64)
    scale = jnp.where(norm2 * (scale * scale) < 0.64, scale * 10.0, scale)

    # return h.sum()  (scalar, written to SMEM)
    out_ref[0] = s_h * scale


def fancy_mlp(x, w, b, rand_weight):
    """x: (B, 20) f32; w: (20, 20) PyTorch-layout (out, in); b: (20,)."""
    B, F = x.shape
    out = pl.pallas_call(
        fancy_mlp_kernel,
        out_shape=jax.ShapeDtypeStruct((1,), jnp.float32),
        in_specs=[
            pl.BlockSpec(memory_space=pltpu.MemorySpace.VMEM),  # x
            pl.BlockSpec(memory_space=pltpu.MemorySpace.VMEM),  # w (out, in)
            pl.BlockSpec(memory_space=pltpu.MemorySpace.VMEM),  # b (1, F)
            pl.BlockSpec(memory_space=pltpu.MemorySpace.VMEM),  # rand_weight
        ],
        out_specs=pl.BlockSpec(memory_space=pltpu.MemorySpace.SMEM),
    )(x, w, b.reshape(1, F), rand_weight)
    return out[0]


def fancy_mlp_ref(x, w, b, rand_weight):
    """Pure-JAX reference mirroring the PyTorch forward exactly."""
    h = x @ w.T + b
    h = jnp.maximum(h @ rand_weight + 1.0, 0.0)
    h = h @ w.T + b
    norm = jnp.linalg.norm(h)
    scale = lax.while_loop(lambda s: norm * s > 1.0, lambda s: s * 0.5,
                           jnp.float32(1.0))
    scale = jnp.where(norm * scale < 0.8, scale * 10.0, scale)
    return jnp.sum(h * scale)


if __name__ == "__main__":
    key = jax.random.PRNGKey(0)
    k_x, k_w, k_b, k_rw = jax.random.split(key, 4)

    B, F = 2, 20
    # Deterministic synthetic params (shapes from FancyMLP.__init__).
    x = jax.random.uniform(k_x, (B, F), dtype=jnp.float32)            # torch.rand(2, 20)-like
    bound = 1.0 / jnp.sqrt(jnp.float32(F))
    w = jax.random.uniform(k_w, (F, F), dtype=jnp.float32,
                           minval=-bound, maxval=bound)                # nn.Linear(20, 20).weight
    b = jax.random.uniform(k_b, (F,), dtype=jnp.float32,
                           minval=-bound, maxval=bound)                # nn.Linear(20, 20).bias
    rand_weight = jax.random.uniform(k_rw, (F, F), dtype=jnp.float32)  # torch.rand((20, 20))

    out = fancy_mlp(x, w, b, rand_weight)
    out = jax.block_until_ready(out)

    ref = fancy_mlp_ref(x, w, b, rand_weight)
    assert jnp.allclose(out, ref, rtol=1e-5, atol=1e-5), (out, ref)

    print("KERNEL_OK")
</pallas_src>

<mosaic_0001>
module attributes {stable_mosaic.version = 11 : i64} {
  func.func @fancy_mlp_kernel(%arg0: memref<2x20xf32, #tpu.memory_space<vmem>>, %arg1: memref<20x20xf32, #tpu.memory_space<vmem>>, %arg2: memref<1x20xf32, #tpu.memory_space<vmem>>, %arg3: memref<20x20xf32, #tpu.memory_space<vmem>>, %arg4: memref<1xf32, #tpu.memory_space<smem>>) attributes {dimension_semantics = [], scalar_prefetch = 0 : i64, scratch_operands = 0 : i64, tpu.core_type = #tpu.core_type<tc>} {
    %c0 = arith.constant 0 : index
    %c0_0 = arith.constant 0 : index
    %0 = vector.load %arg0[%c0, %c0_0] : memref<2x20xf32, #tpu.memory_space<vmem>>, vector<2x20xf32>
    %c0_1 = arith.constant 0 : index
    %c0_2 = arith.constant 0 : index
    %1 = vector.load %arg1[%c0_1, %c0_2] : memref<20x20xf32, #tpu.memory_space<vmem>>, vector<20x20xf32>
    %c0_3 = arith.constant 0 : index
    %c0_4 = arith.constant 0 : index
    %2 = vector.load %arg2[%c0_3, %c0_4] : memref<1x20xf32, #tpu.memory_space<vmem>>, vector<1x20xf32>
    %c0_5 = arith.constant 0 : index
    %c0_6 = arith.constant 0 : index
    %3 = vector.load %arg3[%c0_5, %c0_6] : memref<20x20xf32, #tpu.memory_space<vmem>>, vector<20x20xf32>
    %cst = arith.constant dense<0.000000e+00> : vector<2x20xf32>
    %4 = tpu.matmul %0, %1, %cst {dimension_numbers = #tpu.dot_dimension_numbers<[1], [1], [0], [0], [0, 0, 1, 0], [], []>} : vector<2x20xf32>, vector<20x20xf32>, vector<2x20xf32> -> vector<2x20xf32>
    %5 = vector.broadcast %2 : vector<1x20xf32> to vector<2x20xf32>
    %6 = arith.addf %4, %5 : vector<2x20xf32>
    %cst_7 = arith.constant dense<0.000000e+00> : vector<2x20xf32>
    %7 = tpu.matmul %6, %3, %cst_7 {dimension_numbers = #tpu.dot_dimension_numbers<[1], [0], [0], [1], [0, 0, 1, 1], [], []>} : vector<2x20xf32>, vector<20x20xf32>, vector<2x20xf32> -> vector<2x20xf32>
    %cst_8 = arith.constant 1.000000e+00 : f32
    %8 = vector.broadcast %cst_8 : f32 to vector<2x20xf32>
    %9 = arith.addf %7, %8 : vector<2x20xf32>
    %cst_9 = arith.constant 0.000000e+00 : f32
    %10 = vector.broadcast %cst_9 : f32 to vector<2x20xf32>
    %11 = arith.maximumf %9, %10 : vector<2x20xf32>
    %cst_10 = arith.constant dense<0.000000e+00> : vector<2x20xf32>
    %12 = tpu.matmul %11, %1, %cst_10 {dimension_numbers = #tpu.dot_dimension_numbers<[1], [1], [0], [0], [0, 0, 1, 0], [], []>} : vector<2x20xf32>, vector<20x20xf32>, vector<2x20xf32> -> vector<2x20xf32>
    %13 = vector.broadcast %2 : vector<1x20xf32> to vector<2x20xf32>
    %14 = arith.addf %12, %13 : vector<2x20xf32>
    %15 = arith.mulf %14, %14 : vector<2x20xf32>
    %16 = vector.shape_cast %15 : vector<2x20xf32> to vector<1x2x20xf32>
    %cst_11 = arith.constant dense<0.000000e+00> : vector<1xf32>
    %17 = vector.multi_reduction <add>, %16, %cst_11 [1, 2] : vector<1x2x20xf32> to vector<1xf32>
    %18 = vector.shape_cast %17 : vector<1xf32> to vector<1x1x1xf32>
    %19 = vector.extract %18[0, 0, 0] : f32 from vector<1x1x1xf32>
    %20 = vector.shape_cast %14 : vector<2x20xf32> to vector<1x2x20xf32>
    %cst_12 = arith.constant dense<0.000000e+00> : vector<1xf32>
    %21 = vector.multi_reduction <add>, %20, %cst_12 [1, 2] : vector<1x2x20xf32> to vector<1xf32>
    %22 = vector.shape_cast %21 : vector<1xf32> to vector<1x1x1xf32>
    %23 = vector.extract %22[0, 0, 0] : f32 from vector<1x1x1xf32>
    %24 = math.log %19 : f32
    %cst_13 = arith.constant 2.000000e+00 : f32
    %25 = math.log %cst_13 : f32
    %26 = arith.divf %24, %25 : f32
    %cst_14 = arith.constant 5.000000e-01 : f32
    %27 = arith.mulf %cst_14, %26 : f32
    %28 = math.ceil %27 : f32
    %cst_15 = arith.constant 0.000000e+00 : f32
    %29 = arith.maximumf %28, %cst_15 : f32
    %cst_16 = arith.constant 0.000000e+00 : f32
    %30 = arith.subf %cst_16, %29 : f32
    %31 = math.exp2 %30 : f32
    %32 = arith.mulf %31, %31 : f32
    %33 = arith.mulf %19, %32 : f32
    %cst_17 = arith.constant 1.000000e+00 : f32
    %34 = arith.cmpf ogt, %33, %cst_17 : f32
    %cst_18 = arith.constant 5.000000e-01 : f32
    %35 = arith.mulf %31, %cst_18 : f32
    %36 = arith.select %34, %35, %31 : f32
    %cst_19 = arith.constant 1.000000e+00 : f32
    %37 = arith.cmpf olt, %36, %cst_19 : f32
    %38 = arith.mulf %36, %36 : f32
    %39 = arith.mulf %19, %38 : f32
    %cst_20 = arith.constant 4.000000e+00 : f32
    %40 = arith.mulf %39, %cst_20 : f32
    %cst_21 = arith.constant 1.000000e+00 : f32
    %41 = arith.cmpf ole, %40, %cst_21 : f32
    %42 = arith.andi %37, %41 : i1
    %cst_22 = arith.constant 2.000000e+00 : f32
    %43 = arith.mulf %36, %cst_22 : f32
    %44 = arith.select %42, %43, %36 : f32
    %45 = arith.mulf %44, %44 : f32
    %46 = arith.mulf %19, %45 : f32
    %cst_23 = arith.constant 6.400000e-01 : f32
    %47 = arith.cmpf olt, %46, %cst_23 : f32
    %cst_24 = arith.constant 1.000000e+01 : f32
    %48 = arith.mulf %44, %cst_24 : f32
    %49 = arith.select %47, %48, %44 : f32
    %50 = arith.mulf %23, %49 : f32
    %c0_25 = arith.constant 0 : index
    %51 = memref.load %arg4[%c0_25] : memref<1xf32, #tpu.memory_space<smem>>
    memref.store %50, %arg4[%c0_25] : memref<1xf32, #tpu.memory_space<smem>>
    return
  }
}

</mosaic_0001>

<bundles_post_ra>
// kernel: tpu_custom_call.1
= control target key start
LH: loop header
LB: loop body
LE: loop exit
PB: predicated region body
PF: predicated region fallthrough
CT: control target
= control target key end

     0   :  { %9 = vsyncpa [#allocation3], 0  ;;  %s663_s0 = inlined_call_operand.hbm [shape: f32[2,20], index: 0, kind: input, shape index: {}]   ;;  %s664_s1 = inlined_call_operand.hbm [shape: f32[20,20], index: 1, kind: input, shape index: {}]   ;;  %s665_s2 = inlined_call_operand.vmem [shape: f32[1,20], index: 2, kind: input, shape index: {}]   ;;  %s666_s3 = inlined_call_operand.hbm [shape: f32[20,20], index: 3, kind: input, shape index: {}]   ;;  %s667_s4 = inlined_call_operand.hbm [shape: f32[1], index: 4, kind: output, shape index: {}]  }
   0x1   :  { %10 = vsyncpa [#allocation6], 0 }
   0x2   :  { %11 = vsyncpa [#allocation4], 0  ;;  %s544_s15 = smov [#allocation5]   ;;  %s462_s19 = scalar_lea.hbm %s664_s1, 384 }
   0x3   :  { %s27_s16 = sshll.u32 %s544_s15, 4  ;;  %p463_p0 = scmp.ne.s32.totalorder %s664_s1, %s462_s19  ;;  %s28_s16 = int_to_ptr.vmem [resolvable:$true] %s27_s16 }
   0x4   :  { %p466_p1 = scmp.lt.u32.totalorder %s462_s19, %s664_s1 }
   0x6   :  { %p468_p2 = pnand %p466_p1, %p463_p0 }
   0x8   :  { %471 = shalt.err (!%p468_p2)
}
   0x9   :  { %s472_s24 = scalar_lea.vmem %s28_s16, 384  ;;  %p477_p4 = scmp.lt.s32.totalorder %s28_s16, %s28_s16 }
   0xa   :  { %p473_p3 = scmp.ne.s32.totalorder %s28_s16, %s472_s24  ;;  %p478_p5 = scmp.lt.s32.totalorder %s472_s24, %s472_s24 }
   0xc   :  { %p479_p6 = por %p478_p5, %p477_p4 }
   0xe   :  { %p480_p7 = pnand %p479_p6, %p473_p3 }
  0x10   :  { %483 = shalt.err (!%p480_p7)
}
  0x11   :  { %s545_s25 = smov 128   ;;  %s546_s26 = smov 8  }
  0x12   :  { %33 = dma.hbm_to_vmem [thread:$0]  %s664_s1, 384, %s28_s16, [#allocation6], %s545_s25, %s545_s25, %s546_s26  }
  0x13   :  { %s547_s29 = smov [#allocation2]   ;;  %s548_s5 = smov [#allocation7]  }
  0x14   :  { %s18_s30 = sshll.u32 %s547_s29, 4  ;;  %s41_s6 = sshll.u32 %s548_s5, 4  ;;  %s19_s30 = int_to_ptr.vmem [resolvable:$true] %s18_s30  ;;  %s42_s6 = int_to_ptr.vmem [resolvable:$true] %s41_s6 }
  0x15   :  { %s484_s9 = scalar_lea.hbm %s663_s0, 32 }
  0x16   :  { %p485_p8 = scmp.ne.s32.totalorder %s663_s0, %s484_s9  ;;  %p488_p9 = scmp.lt.u32.totalorder %s484_s9, %s663_s0 }
  0x18   :  { %p490_p10 = pnand %p488_p9, %p485_p8 }
  0x1a   :  { %493 = shalt.err (!%p490_p10)
}
  0x1b   :  { %s494_s1 = scalar_lea.vmem %s19_s30, 32  ;;  %p499_p12 = scmp.lt.s32.totalorder %s19_s30, %s19_s30 }
  0x1c   :  { %p495_p11 = scmp.ne.s32.totalorder %s19_s30, %s494_s1  ;;  %p500_p13 = scmp.lt.s32.totalorder %s494_s1, %s494_s1 }
  0x1e   :  { %p501_p0 = por %p500_p13, %p499_p12 }
  0x20   :  { %p502_p1 = pnand %p501_p0, %p495_p11 }
  0x22   :  { %505 = shalt.err (!%p502_p1)
}
  0x23   :  { %21 = dma.hbm_to_vmem [thread:$0]  %s663_s0, 32, %s19_s30, [#allocation3]  }
  0x24   :  { %s506_s18 = scalar_lea.hbm %s666_s3, 384 }
  0x25   :  { %p507_p2 = scmp.ne.s32.totalorder %s666_s3, %s506_s18  ;;  %p510_p3 = scmp.lt.u32.totalorder %s506_s18, %s666_s3 }
  0x27   :  { %p512_p4 = pnand %p510_p3, %p507_p2 }
  0x29   :  { %515 = shalt.err (!%p512_p4)
}
  0x2a   :  { %s516_s23 = scalar_lea.vmem %s42_s6, 384  ;;  %p521_p6 = scmp.lt.s32.totalorder %s42_s6, %s42_s6 }
  0x2b   :  { %p517_p5 = scmp.ne.s32.totalorder %s42_s6, %s516_s23  ;;  %p522_p7 = scmp.lt.s32.totalorder %s516_s23, %s516_s23 }
  0x2d   :  { %p523_p8 = por %p522_p7, %p521_p6 }
  0x2f   :  { %p524_p9 = pnand %p523_p8, %p517_p5 }
  0x31   :  { %527 = shalt.err (!%p524_p9)
}
  0x32   :  { %47 = dma.hbm_to_vmem [thread:$0]  %s666_s3, 384, %s42_s6, [#allocation6], %s545_s25, %s545_s25, %s546_s26  }
  0x33   :  { %538 = dma.done.wait [#allocation3], 32  }
  0x34   :  { %539 = vsyncadd [#allocation3], 4294967264 }
  0x35   :  { %540 = dma.done.wait [#allocation6], 768  }
  0x36   :  { %541 = vsyncadd [#allocation6], 4294966528  ;;  %v549_v0 = vmov 0.0|0.0   ;;  %vm550_vm0 = vmmov 0   ;;  %v551_v1 = vmov 0.0   ;;  %vm71_vm1 = vcmask 162816  }
  0x37   :  { %429 = vmatprep.subr.bf16.mxu0 %v549_v0  ;;  %408 = vmatprep.mubr.msk.f32.mxu0 %vm550_vm0, %v551_v1  ;;  %v58_v2 = vld [vmem:[#allocation5] sm:$0xff]  ;;  %v59_v3 = vld [vmem:[#allocation5 + $0x8] sm:$0xff]  ;;  %vm625_vm2 = vmpackc.low %vm71_vm1, %vm71_vm1  ;;  %vm157_vm3 = vcmask 1043456   ;;  %vm306_vm4 = vcmask 156672   ;;  %s552_s5 = smov 0.0   ;;  %s528_s21 = scalar_lea.hbm %s667_s4, 16 }
  0x38   :  { %433 = vmatprep.subr.bf16.mxu1 %v549_v0  ;;  %417 = vmatprep.mubr.msk.f32.mxu1 %vm550_vm0, %v551_v1  ;;  %v430_v5 = vpack.c.bf16 %v59_v3, %v58_v2  ;;  %v62_v6 = vld [vmem:[#allocation7] sm:$0xff]  ;;  %v63_v7 = vld [vmem:[#allocation7 + $0x8] sm:$0xff]  ;;  %v60_v9 = vld [vmem:[#allocation5 + $0x10] sm:$0xf]  ;;  %p529_p1 = scmp.ne.s32.totalorder %s667_s4, %s528_s21  ;;  %p532_p2 = scmp.lt.u32.totalorder %s528_s21, %s667_s4 }
  0x39   :  { %v434_v8 = vpack.c.bf16 %v63_v7, %v62_v6  ;;  %v57_v10 = vld [vmem:[#allocation2] sm:$0x3]  ;;  %v64_v11 = vld [vmem:[#allocation7 + $0x10] sm:$0xf] }
  0x3a   :  { %432 = vmatpush3.bf16.xpose.msk.msra.mxu0 %vm625_vm2, %v430_v5  ;;  %v378_v12 = vld [vmem:[%s665_s2] ss:$0 sm:$0xff]  ;;  %p534_p3 = pnand %p532_p2, %p529_p1 }
  0x3b   :  { %406 = vmatprep.subr.mxu0 %v551_v1  ;;  %435 = vmatpush3.bf16.msra.mxu1 %v434_v8 }
  0x3c   :  { %415 = vmatprep.subr.mxu1 %v551_v1 }
  0x3f   :  { %416 = vmatpush3.msk.msra.mxu1 %vm157_vm3, %v64_v11 }
  0x40   :  { %436 = vmatprep.subr.bf16.mxu1 %v549_v0 }
  0x42   :  { %407 = vmatpush3.xpose.msk.msra.mxu0 %vm71_vm1, %v60_v9 }
  0x45   :  { %409 = vmatmul.mubr.msk.f32.vlgmr.msra.gmra.mrb[0].mxu0 %vm71_vm1, %v57_v10 }
 0x118   :  { %v150_v13 = vpop.f32.mrb[0].mxu0 }
 0x119   :  { %v151_v14 = vadd.f32 %v378_v12, %v150_v13  ;;  %v410_v15 = vpop.f32.mrb[1].mxu0 }
 0x11b   :  { %418 = vmatmul.mubr.msk.f32.vlgmr.msra.gmra.mrb[0].mxu1 %vm71_vm1, %v151_v14 }
 0x11c   :  { %439 = vmatpush3.bf16.xpose.msk.msra.mxu1 %vm625_vm2, %v430_v5  ;;  %426 = vmatprep.mubr.msk.f32.mxu1 %vm550_vm0, %v551_v1 }
 0x11d   :  { %424 = vmatprep.subr.mxu1 %v551_v1 }
 0x124   :  { %425 = vmatpush3.xpose.msk.msra.mxu1 %vm71_vm1, %v60_v9 }
 0x1ee   :  { %v227_v16 = vpop.f32.mrb[0].mxu1 }
 0x1ef   :  { %v228_v17 = vadd.f32 1.0, %v227_v16  ;;  %v419_v18 = vpop.f32.mrb[1].mxu1 }
 0x1f1   :  { %v231_v19 = vmax.f32 %v228_v17, 0.0 }
 0x1f3   :  { %427 = vmatmul.mubr.msk.f32.vlgmr.msra.gmra.mrb[2].mxu1 %vm71_vm1, %v231_v19 }
 0x2c6   :  { %v301_v20 = vpop.f32.mrb[2].mxu1 }
 0x2c7   :  { %v302_v21 = vadd.f32 %v378_v12, %v301_v20  ;;  %v428_v22 = vpop.f32.mrb[3].mxu1 }
 0x2c9   :  { %v305_v23 = vmul.f32 %v302_v21, %v302_v21  ;;  %v317_v25 = vsel %vm306_vm4, %v302_v21, 0.0 }
 0x2cb   :  { %v307_v24 = vsel %vm306_vm4, %v305_v23, 0.0 }
 0x2cc   :  { %308 = vadd.xlane.f32.xlu0 %v307_v24 }
 0x2d0   :  { %318 = vadd.xlane.f32.xlu0 %v317_v25 }
 0x359   :  { %v309_v26 = vpop.xlane.xlu0 %308 }
 0x35a   :  { %v310_v27 = vrot.slane %v309_v26, 4 }
 0x35c   :  { %v311_v28 = vadd.f32 %v310_v27, %v309_v26 }
 0x35d   :  { %v319_v29 = vpop.xlane.xlu0 %318 }
 0x35e   :  { %v312_v30 = vrot.slane %v311_v28, 2  ;;  %v320_v31 = vrot.slane %v319_v29, 4 }
 0x360   :  { %v321_v32 = vadd.f32 %v320_v31, %v319_v29  ;;  %v313_v33 = vadd.f32 %v312_v30, %v311_v28 }
 0x362   :  { %v322_v34 = vrot.slane %v321_v32, 2  ;;  %v314_v35 = vrot.slane %v313_v33, 1 }
 0x364   :  { %v323_v36 = vadd.f32 %v322_v34, %v321_v32  ;;  %v315_v37 = vadd.f32 %v314_v35, %v313_v33 }
 0x366   :  { %440 = vpush %v315_v37  ;;  %v324_v38 = vrot.slane %v323_v36, 1 }
 0x368   :  { %v325_v39 = vadd.f32 %v324_v38, %v323_v36 }
 0x36a   :  { %442 = vpush %v325_v39 }
 0x397   :  { %s642_s2 = spop %440 }
 0x398   :  { %v327_v40 = vstv %s642_s2 }
 0x399   :  { %458 = vlog2.f32 %v327_v40 }
 0x39b   :  { %s645_s26 = spop %442 }
 0x3a3   :  { %v459_v41 = vpop.eup %458 }
 0x3a4   :  { %v329_v42 = vmul.f32 0.6931472, %v459_v41 }
 0x3a6   :  { %444 = vpush %v329_v42 }
 0x3d7   :  { %s445_s27 = spop %444 }
 0x3d8   :  { %s333_s28 = smul.f32 1.442695, %s445_s27 }
 0x3da   :  { %s334_s29 = smul.f32 0.5, %s333_s28 }
 0x3dc   :  { %s335_s30 = sceil.f32 %s334_s29 }
 0x3dd   :  { %s336_s6 = smax.f32 %s552_s5, %s335_s30 }
 0x3de   :  { %s337_s7 = ssub.f32 0.0, %s336_s6 }
 0x3e0   :  { %v338_v43 = vstv %s337_s7 }
 0x3e1   :  { %460 = vpow2.f32 %v338_v43 }
 0x3eb   :  { %v461_v44 = vpop.eup %460 }
 0x3ec   :  { %446 = vpush %v461_v44 }
 0x41d   :  { %s447_s8 = spop %446 }
 0x41e   :  { %s341_s9 = smul.f32 %s447_s8, %s447_s8 }
 0x41f   :  { %s344_s11 = smul.f32 0.5, %s447_s8 }
 0x420   :  { %s342_s10 = smul.f32 %s642_s2, %s341_s9 }
 0x422   :  { %p343_p10 = scmp.gt.f32.partialorder %s342_s10, 1.0 }
 0x424   :  { %s671_s11 = smov (!%p343_p10, %s344_s11), %s447_s8 }
 0x425   :  { %s347_s12 = smul.f32 %s671_s11, %s671_s11  ;;  %p346_p11 = scmp.lt.f32.partialorder %s671_s11, 1.0 }
 0x426   :  { %s353_s14 = smul.f32 2.0, %s671_s11 }
 0x427   :  { %s348_s13 = smul.f32 %s642_s2, %s347_s12 }
 0x429   :  { %s349_s1 = smul.f32 4.0, %s348_s13 }
 0x42b   :  { %p350_p12 = scmp.le.f32.partialorder %s349_s1, 1.0 }
 0x42d   :  { %p351_p13 = pnand %p350_p12, %p346_p11 }
 0x42f   :  { %s673_s11 = smov (!%p351_p13, %s671_s11), %s353_s14 }
 0x430   :  { %s355_s15 = smul.f32 %s673_s11, %s673_s11 }
 0x431   :  { %s358_s17 = smul.f32 10.0, %s673_s11 }
 0x432   :  { %s356_s16 = smul.f32 %s642_s2, %s355_s15 }
 0x434   :  { %p357_p0 = scmp.lt.f32.partialorder %s356_s16, 0.64 }
 0x436   :  { %s675_s17 = smov (!%p357_p0, %s358_s17), %s673_s11 }
 0x437   :  { %s360_s18 = smul.f32 %s645_s26, %s675_s17 }
 0x439   :  { %362 = sst [smem:[#allocation8]] %s360_s18 }
 0x43a   :  { %537 = shalt.err (!%p534_p3)
}
 0x43b   :  { %s553_s3 = smov [#allocation8]  }
 0x43c   :  { %370 = dma.smem_to_hbm %s553_s3, 16, %s667_s4, [#allocation4]  }
 0x43d   :  { %542 = dma.done.wait [#allocation4], 16  }
 0x43e   :  { %543 = vsyncadd [#allocation4], 4294967280 }
 0x43f   :  { %374 = sfence }
 0x440   :  { %375 = vsyncpa [#allocation3], 1 }
 0x441   :  { %376 = vsyncpa [#allocation6], 1 }
 0x442   :  { %377 = vsyncpa [#allocation4], 1 }

</bundles_post_ra>
